<compile_context>
chip_gen: v6e
topology: v6e:2x2x1
jax: 0.10.0
libtpu: 0.0.40
codegen_flags: <defaults>
</compile_context>

<pallas_src>
import functools

import jax
import jax.numpy as jnp
from jax.experimental import pallas as pl
from jax.experimental.pallas import tpu as pltpu

LANE = 128


def _round_up(x, m):
    return ((x + m - 1) // m) * m


def _sublane_multiple(dtype):
    # 8 rows for 32-bit, 16 for bf16/f16, 32 for int8/fp8 (packed sublanes).
    return max(8, 32 // jnp.dtype(dtype).itemsize)


def _vmem_capacity_bytes():
    try:
        return int(pltpu.get_tpu_info().vmem_capacity_bytes)
    except Exception:
        return 64 << 20  # conservative fallback: fits every TPU generation


def _choose_block_batch(batch, per_row_bytes, resident_bytes, budget_bytes, sub):
    """Largest sublane-aligned batch tile whose pipelined footprint fits."""
    avail = budget_bytes - resident_bytes
    fit = max(int(avail // max(per_row_bytes, 1)), 1)
    if batch <= sub:
        return batch                    # single tile; block dims == array dims
    tb = min(fit, batch)
    if tb < sub:
        return sub                      # floor: smallest sublane-aligned tile
    tb = (tb // sub) * sub
    # Keep >= 2 grid steps so the "parallel" batch axis can shard across both
    # v7x TensorCores; the ~0.35 us per-step overhead is negligible at these
    # tile sizes (and harmless on single-core v5e/v6e).
    if tb >= batch and batch >= 2 * sub:
        tb = max(sub, ((batch // 2) // sub) * sub)
    return tb


def _resident_spec(block_shape, index_map, single_buffer):
    # Constant index_map -> the block never changes across the grid, so one
    # buffer is enough; saves a full extra copy of W in VMEM.
    if single_buffer:
        return pl.BlockSpec(block_shape, index_map, pipeline_mode=pl.Buffered(1))
    return pl.BlockSpec(block_shape, index_map)


def _output_layer_kernel(x_ref, w_ref, b_ref, o_ref, *, inv_hw, lhs_dtype):
    # x_ref: (tb, HW, C)  channels-last batch tile (HW on sublanes, C on lanes)
    # w_ref: (C, OUT_P)   fc weight stored (in, out), OUT padded to 128 lanes
    # b_ref: (1, OUT_P)   fc bias, f32, padded
    # o_ref: (tb, OUT_P)  lane-dense output tile

    # Global average pool over HW (sublane axis): cross-vreg VPU adds plus a
    # short sublane tree, accumulated in f32.  Result (tb, C) is lane-dense in
    # C, i.e. exactly the MXU LHS layout (no relayout before the dot).
    # (Worst-case f32 upcast temp of the tile is included in the VMEM budget.)
    pooled32 = jnp.sum(x_ref[...].astype(jnp.float32), axis=1) * inv_hw

    # MXU with f32 accumulation.  f32 stays f32, bf16 stays bf16; quantized
    # inputs use a bf16 LHS rather than re-quantizing the pooled activations.
    pooled = pooled32.astype(lhs_dtype)
    acc = jnp.dot(pooled, w_ref[...], preferred_element_type=jnp.float32)

    o_ref[...] = (acc + b_ref[...]).astype(o_ref.dtype)


@functools.partial(jax.jit, static_argnames=("single_buffer_weights",))
def _output_layer_impl(x, w, b, *, single_buffer_weights):
    """x: [B, C, H, W];  w: [C, OUT] (transposed torch weight);  b: [OUT]."""
    batch, chan, h, wdt = x.shape
    assert w.shape[0] == chan, f"w.shape[0]={w.shape[0]} must equal channels={chan}"
    out_features = w.shape[1]
    assert b.shape == (out_features,), "bias shape must be (out_features,)"

    hw = h * wdt
    dt = x.dtype
    itemsize = jnp.dtype(dt).itemsize
    sub = _sublane_multiple(dt)

    # NCHW -> channels-last (B, HW, C): one extra HBM pass in the wrapper, but
    # the in-kernel pool becomes a sublane/VPU reduce (not a cross-lane XLU
    # tree) and the pooled activations land directly in the MXU LHS layout.
    x_cl = x.reshape(batch, chan, hw).transpose(0, 2, 1)

    # Lane-dense output slab: pad OUT to a multiple of 128 so stores are
    # unmasked; sliced back to out_features at the end.
    out_p = LANE * pl.cdiv(out_features, LANE)
    if out_p != out_features:
        w_p = jnp.pad(w, ((0, 0), (0, out_p - out_features)))
        b_p = jnp.pad(b, (0, out_p - out_features))
    else:
        w_p, b_p = w, b
    b2d = b_p.astype(jnp.float32).reshape(1, out_p)  # cast once, outside kernel

    # ---- generation-aware VMEM budget & batch-tile size --------------------
    vmem_cap = _vmem_capacity_bytes()
    budget = int(vmem_cap * 0.78)        # ~100 MiB on v5e/v6e, ~50 MiB on v7x

    hw_pad = _round_up(hw, sub)          # sublane padding of the x tile
    c_pad = _round_up(chan, LANE)        # lane padding of the x tile
    x_row = hw_pad * c_pad * itemsize                      # 1 batch row, x tile
    x_row_f32 = hw_pad * c_pad * 4 if itemsize < 4 else 0  # upcast temp, worst case
    o_row = out_p * itemsize
    per_row = 2 * (x_row + o_row) + x_row_f32              # double-buffered tiles
    w_sub = _sublane_multiple(w_p.dtype)
    w_bufs = 1 if single_buffer_weights else 2
    resident = w_bufs * (_round_up(chan, w_sub) * out_p * jnp.dtype(w_p.dtype).itemsize
                         + out_p * 4) + (2 << 20)          # + compiler scratch headroom

    block_batch = _choose_block_batch(batch, per_row, resident, budget, sub)

    # Pad the batch (zero rows) up to a multiple of the tile instead of falling
    # back to one giant tile for awkward batch sizes; extra rows are sliced off.
    batch_p = _round_up(batch, block_batch)
    if batch_p != batch:
        x_cl = jnp.pad(x_cl, ((0, batch_p - batch), (0, 0), (0, 0)))
    grid = (batch_p // block_batch,)

    vmem_need = block_batch * per_row + resident
    vmem_limit = int(min(max(vmem_need, 4 << 20), int(vmem_cap * 0.85)))

    # MXU LHS dtype (never silently re-quantize the pooled activations).
    if dt == jnp.float32 or dt == jnp.bfloat16:
        lhs_dtype = dt
    else:
        lhs_dtype = jnp.bfloat16

    kernel = functools.partial(_output_layer_kernel, inv_hw=1.0 / hw,
                               lhs_dtype=lhs_dtype)

    out_padded = pl.pallas_call(
        kernel,
        out_shape=jax.ShapeDtypeStruct((batch_p, out_p), dt),
        grid_spec=pltpu.PrefetchScalarGridSpec(
            num_scalar_prefetch=0,
            grid=grid,
            in_specs=[
                # x tile: channels-last, batch-tiled, double-buffered by Pallas.
                pl.BlockSpec((block_batch, hw, chan), lambda i: (i, 0, 0)),
                # Weights / bias: constant index_map -> resident across the grid.
                _resident_spec((chan, out_p), lambda i: (0, 0), single_buffer_weights),
                _resident_spec((1, out_p), lambda i: (0, 0), single_buffer_weights),
            ],
            out_specs=pl.BlockSpec((block_batch, out_p), lambda i: (i, 0)),
        ),
        compiler_params=pltpu.CompilerParams(
            dimension_semantics=("parallel",),
            vmem_limit_bytes=vmem_limit,
        ),
    )(x_cl, w_p, b2d)

    return out_padded[:batch, :out_features]


def output_layer(x, w, b):
    """OutputLayer forward: global average pool over (H, W), then fc."""
    try:
        # Preferred path: single-buffered (resident) weight/bias blocks.
        return _output_layer_impl(x, w, b, single_buffer_weights=True)
    except Exception:
        # Fallback for jax versions whose TPU pipeline rejects pipeline_mode.
        return _output_layer_impl(x, w, b, single_buffer_weights=False)


def _reference(x, w, b):
    """Pure-JAX reference mirroring the PyTorch forward."""
    pooled = jnp.mean(x.astype(jnp.float32), axis=(2, 3))       # [B, C]
    out = pooled @ w.astype(jnp.float32) + b.astype(jnp.float32)
    return out.astype(x.dtype)


if __name__ == "__main__":
    # Small shapes consistent with the module: batch=2, channels(=in_features)=4,
    # spatial 16x16, out_features=80 (the nn.Linear default in the module).
    batch, chan, h, wdt = 2, 4, 16, 16
    out_features = 80

    key = jax.random.PRNGKey(0)
    kx, kw, kb = jax.random.split(key, 3)

    x = jax.random.normal(kx, (batch, chan, h, wdt), dtype=jnp.float32)
    # PyTorch Linear weight is (out, in); we pass the transposed (in, out) form.
    w = jax.random.normal(kw, (chan, out_features), dtype=jnp.float32) * 0.1
    b = jax.random.normal(kb, (out_features,), dtype=jnp.float32) * 0.1

    out = jax.block_until_ready(output_layer(x, w, b))
    ref = _reference(x, w, b)

    assert out.shape == (batch, out_features) and out.dtype == x.dtype
    assert jnp.allclose(out, ref, atol=1e-4, rtol=1e-4), "mismatch vs reference"

    print("KERNEL_OK")
</pallas_src>

<mosaic_0001>
module attributes {stable_mosaic.version = 11 : i64} {
  func.func @_output_layer_kernel(%arg0: i32, %arg1: memref<2x256x4xf32, #tpu.memory_space<vmem>>, %arg2: memref<4x128xf32, #tpu.memory_space<vmem>>, %arg3: memref<1x128xf32, #tpu.memory_space<vmem>>, %arg4: memref<2x128xf32, #tpu.memory_space<vmem>>) attributes {dimension_semantics = [#tpu.dimension_semantics<parallel>], iteration_bounds = array<i64: 1>, scalar_prefetch = 0 : i64, scratch_operands = 0 : i64, tpu.core_type = #tpu.core_type<tc>, window_params = [{transform_indices = @transform_0, window_bounds = array<i64: 2, 256, 4>}, {pipeline_mode = #tpu.pipeline_mode<synchronous>, transform_indices = @transform_1, window_bounds = array<i64: 4, 128>}, {pipeline_mode = #tpu.pipeline_mode<synchronous>, transform_indices = @transform_2, window_bounds = array<i64: 1, 128>}, {transform_indices = @transform_3, window_bounds = array<i64: 2, 128>}]} {
    %c0 = arith.constant 0 : index
    %c0_0 = arith.constant 0 : index
    %c0_1 = arith.constant 0 : index
    %0 = vector.load %arg1[%c0, %c0_0, %c0_1] : memref<2x256x4xf32, #tpu.memory_space<vmem>>, vector<2x256x4xf32>
    %cst = arith.constant dense<0.000000e+00> : vector<2x4xf32>
    %1 = vector.multi_reduction <add>, %0, %cst [1] : vector<2x256x4xf32> to vector<2x4xf32>
    %cst_2 = arith.constant 3.906250e-03 : f32
    %2 = vector.broadcast %cst_2 : f32 to vector<2x4xf32>
    %3 = arith.mulf %1, %2 : vector<2x4xf32>
    %c0_3 = arith.constant 0 : index
    %c0_4 = arith.constant 0 : index
    %4 = vector.load %arg2[%c0_3, %c0_4] : memref<4x128xf32, #tpu.memory_space<vmem>>, vector<4x128xf32>
    %cst_5 = arith.constant dense<0.000000e+00> : vector<2x128xf32>
    %5 = tpu.matmul %3, %4, %cst_5 {dimension_numbers = #tpu.dot_dimension_numbers<[1], [0], [0], [1], [0, 0, 1, 1], [], []>} : vector<2x4xf32>, vector<4x128xf32>, vector<2x128xf32> -> vector<2x128xf32>
    %c0_6 = arith.constant 0 : index
    %c0_7 = arith.constant 0 : index
    %6 = vector.load %arg3[%c0_6, %c0_7] : memref<1x128xf32, #tpu.memory_space<vmem>>, vector<1x128xf32>
    %7 = vector.broadcast %6 : vector<1x128xf32> to vector<2x128xf32>
    %8 = arith.addf %5, %7 : vector<2x128xf32>
    %c0_8 = arith.constant 0 : index
    %c0_9 = arith.constant 0 : index
    %9 = vector.load %arg4[%c0_8, %c0_9] : memref<2x128xf32, #tpu.memory_space<vmem>>, vector<2x128xf32>
    tpu.vector_store %arg4[%c0_8, %c0_9], %8 {strides = array<i32>} : memref<2x128xf32, #tpu.memory_space<vmem>>, vector<2x128xf32>,
    return
  }
  func.func @transform_0(%arg0: i32) -> (i32, i32, i32) {
    %c0_i32 = arith.constant 0 : i32
    %c0_i32_0 = arith.constant 0 : i32
    %c0_i32_1 = arith.constant 0 : i32
    return %arg0, %c0_i32, %c0_i32_0 : i32, i32, i32
  }
  func.func @transform_1(%arg0: i32) -> (i32, i32) {
    %c0_i32 = arith.constant 0 : i32
    %c0_i32_0 = arith.constant 0 : i32
    %c0_i32_1 = arith.constant 0 : i32
    return %c0_i32, %c0_i32_0 : i32, i32
  }
  func.func @transform_2(%arg0: i32) -> (i32, i32) {
    %c0_i32 = arith.constant 0 : i32
    %c0_i32_0 = arith.constant 0 : i32
    %c0_i32_1 = arith.constant 0 : i32
    return %c0_i32, %c0_i32_0 : i32, i32
  }
  func.func @transform_3(%arg0: i32) -> (i32, i32) {
    %c0_i32 = arith.constant 0 : i32
    %c0_i32_0 = arith.constant 0 : i32
    return %arg0, %c0_i32 : i32, i32
  }
}

module attributes {stable_mosaic.version = 11 : i64} {
  func.func @_output_layer_kernel(%arg0: i32, %arg1: memref<2x256x4xf32, #tpu.memory_space<vmem>>, %arg2: memref<4x128xf32, #tpu.memory_space<vmem>>, %arg3: memref<1x128xf32, #tpu.memory_space<vmem>>, %arg4: memref<2x128xf32, #tpu.memory_space<vmem>>) attributes {dimension_semantics = [#tpu.dimension_semantics<parallel>], iteration_bounds = array<i64: 1>, scalar_prefetch = 0 : i64, scratch_operands = 0 : i64, tpu.core_type = #tpu.core_type<tc>, window_params = [{transform_indices = @transform_0, window_bounds = array<i64: 2, 256, 4>}, {pipeline_mode = #tpu.pipeline_mode<synchronous>, transform_indices = @transform_1, window_bounds = array<i64: 4, 128>}, {pipeline_mode = #tpu.pipeline_mode<synchronous>, transform_indices = @transform_2, window_bounds = array<i64: 1, 128>}, {transform_indices = @transform_3, window_bounds = array<i64: 2, 128>}]} {
    %c0 = arith.constant 0 : index
    %c0_0 = arith.constant 0 : index
    %c0_1 = arith.constant 0 : index
    %0 = vector.load %arg1[%c0, %c0_0, %c0_1] : memref<2x256x4xf32, #tpu.memory_space<vmem>>, vector<2x256x4xf32>
    %cst = arith.constant dense<0.000000e+00> : vector<2x4xf32>
    %1 = vector.multi_reduction <add>, %0, %cst [1] : vector<2x256x4xf32> to vector<2x4xf32>
    %cst_2 = arith.constant 3.906250e-03 : f32
    %2 = vector.broadcast %cst_2 : f32 to vector<2x4xf32>
    %3 = arith.mulf %1, %2 : vector<2x4xf32>
    %c0_3 = arith.constant 0 : index
    %c0_4 = arith.constant 0 : index
    %4 = vector.load %arg2[%c0_3, %c0_4] : memref<4x128xf32, #tpu.memory_space<vmem>>, vector<4x128xf32>
    %cst_5 = arith.constant dense<0.000000e+00> : vector<2x128xf32>
    %5 = tpu.matmul %3, %4, %cst_5 {dimension_numbers = #tpu.dot_dimension_numbers<[1], [0], [0], [1], [0, 0, 1, 1], [], []>} : vector<2x4xf32>, vector<4x128xf32>, vector<2x128xf32> -> vector<2x128xf32>
    %c0_6 = arith.constant 0 : index
    %c0_7 = arith.constant 0 : index
    %6 = vector.load %arg3[%c0_6, %c0_7] : memref<1x128xf32, #tpu.memory_space<vmem>>, vector<1x128xf32>
    %7 = vector.broadcast %6 : vector<1x128xf32> to vector<2x128xf32>
    %8 = arith.addf %5, %7 : vector<2x128xf32>
    %c0_8 = arith.constant 0 : index
    %c0_9 = arith.constant 0 : index
    %9 = vector.load %arg4[%c0_8, %c0_9] : memref<2x128xf32, #tpu.memory_space<vmem>>, vector<2x128xf32>
    tpu.vector_store %arg4[%c0_8, %c0_9], %8 {strides = array<i32>} : memref<2x128xf32, #tpu.memory_space<vmem>>, vector<2x128xf32>,
    return
  }
  func.func @transform_0(%arg0: i32) -> (i32, i32, i32) {
    %c0_i32 = arith.constant 0 : i32
    %c0_i32_0 = arith.constant 0 : i32
    %c0_i32_1 = arith.constant 0 : i32
    return %arg0, %c0_i32, %c0_i32_0 : i32, i32, i32
  }
  func.func @transform_1(%arg0: i32) -> (i32, i32) {
    %c0_i32 = arith.constant 0 : i32
    %c0_i32_0 = arith.constant 0 : i32
    %c0_i32_1 = arith.constant 0 : i32
    return %c0_i32, %c0_i32_0 : i32, i32
  }
  func.func @transform_2(%arg0: i32) -> (i32, i32) {
    %c0_i32 = arith.constant 0 : i32
    %c0_i32_0 = arith.constant 0 : i32
    %c0_i32_1 = arith.constant 0 : i32
    return %c0_i32, %c0_i32_0 : i32, i32
  }
  func.func @transform_3(%arg0: i32) -> (i32, i32) {
    %c0_i32 = arith.constant 0 : i32
    %c0_i32_0 = arith.constant 0 : i32
    return %arg0, %c0_i32 : i32, i32
  }
}

</mosaic_0001>

<bundles_post_ra>
// kernel: _output_layer_impl.1
= control target key start
LH: loop header
LB: loop body
LE: loop exit
PB: predicated region body
PF: predicated region fallthrough
CT: control target
= control target key end

     0   :  { %vm234_vm0 = vcmask 1043456   ;;  %v358_v2 = vmov 0.0   ;;  %vm359_vm1 = vmmov 0   ;;  %vm79_vm2 = vcmask 31744   ;;  %s647_s0 = inlined_call_operand.vmem [shape: f32[2,256,4], index: 0, kind: input, shape index: {}]   ;;  %s648_s1 = inlined_call_operand.vmem [shape: f32[4,128], index: 1, kind: input, shape index: {}]   ;;  %s649_s2 = inlined_call_operand.vmem [shape: f32[1,128], index: 2, kind: input, shape index: {}]   ;;  %s650_s3 = inlined_call_operand.hbm [shape: f32[2,128], index: 3, kind: output, shape index: {}]  }
   0x1   :  { %v220_v0 = vld [vmem:[%s648_s1] sm:$0xf]  ;;  %328 = vmatprep.subr.mxu0 %v358_v2  ;;  %330 = vmatprep.mubr.msk.f32.mxu0 %vm359_vm1, %v358_v2  ;;  %v16_v3 = vld [vmem:[%s647_s0 + $0x8] sm:$0xff]  ;;  %v17_v4 = vld [vmem:[%s647_s0 + $0x10] sm:$0xff] }
   0x2   :  { %v15_v1 = vld [vmem:[%s647_s0] sm:$0xff]  ;;  %v18_v5 = vld [vmem:[%s647_s0 + $0x18] sm:$0xff]  ;;  %329 = vmatpush3.msk.msra.mxu0 %vm234_vm0, %v220_v0  ;;  %v81_v7 = vsel %vm79_vm2, %v16_v3, 0.0  ;;  %v83_v8 = vsel %vm79_vm2, %v17_v4, 0.0  ;;  %v20_v12 = vld [vmem:[%s647_s0 + $0x28] sm:$0xff] }
   0x3   :  { %v80_v6 = vsel %vm79_vm2, %v15_v1, 0.0  ;;  %v19_v9 = vld [vmem:[%s647_s0 + $0x20] sm:$0xff]  ;;  %v85_v11 = vsel %vm79_vm2, %v18_v5, 0.0  ;;  %v21_v15 = vld [vmem:[%s647_s0 + $0x30] sm:$0xff]  ;;  %v89_v17 = vsel %vm79_vm2, %v20_v12, 0.0  ;;  %v22_v18 = vld [vmem:[%s647_s0 + $0x38] sm:$0xff] }
   0x4   :  { %v82_v10 = vadd.f32 %v81_v7, %v80_v6  ;;  %v87_v14 = vsel %vm79_vm2, %v19_v9, 0.0  ;;  %v91_v20 = vsel %vm79_vm2, %v21_v15, 0.0  ;;  %v23_v21 = vld [vmem:[%s647_s0 + $0x40] sm:$0xff]  ;;  %v48_v23 = vld [vmem:[%s647_s0 + $0x108] sm:$0xff]  ;;  %v49_v25 = vld [vmem:[%s647_s0 + $0x110] sm:$0xff]  ;;  %v93_v27 = vsel %vm79_vm2, %v22_v18, 0.0 }
   0x5   :  { %v47_v22 = vld [vmem:[%s647_s0 + $0x100] sm:$0xff]  ;;  %v50_v26 = vld [vmem:[%s647_s0 + $0x118] sm:$0xff]  ;;  %v24_v29 = vld [vmem:[%s647_s0 + $0x48] sm:$0xff]  ;;  %v150_v31 = vsel %vm79_vm2, %v48_v23, 0.0  ;;  %v152_v32 = vsel %vm79_vm2, %v49_v25, 0.0  ;;  %v95_v34 = vsel %vm79_vm2, %v23_v21, 0.0 }
   0x6   :  { %v84_v13 = vadd.f32 %v83_v8, %v82_v10  ;;  %v149_v28 = vsel %vm79_vm2, %v47_v22, 0.0  ;;  %v51_v33 = vld [vmem:[%s647_s0 + $0x120] sm:$0xff]  ;;  %v25_v36 = vld [vmem:[%s647_s0 + $0x50] sm:$0xff]  ;;  %v154_v38 = vsel %vm79_vm2, %v50_v26, 0.0  ;;  %v52_v39 = vld [vmem:[%s647_s0 + $0x128] sm:$0xff]  ;;  %v97_v40 = vsel %vm79_vm2, %v24_v29, 0.0 }
   0x7   :  { %v151_v35 = vadd.f32 %v150_v31, %v149_v28  ;;  %v26_v42 = vld [vmem:[%s647_s0 + $0x58] sm:$0xff]  ;;  %v156_v44 = vsel %vm79_vm2, %v51_v33, 0.0  ;;  %v53_v45 = vld [vmem:[%s647_s0 + $0x130] sm:$0xff]  ;;  %v99_v46 = vsel %vm79_vm2, %v25_v36, 0.0  ;;  %v27_v48 = vld [vmem:[%s647_s0 + $0x60] sm:$0xff]  ;;  %v158_v50 = vsel %vm79_vm2, %v52_v39, 0.0 }
   0x8   :  { %v86_v16 = vadd.f32 %v85_v11, %v84_v13  ;;  %v54_v51 = vld [vmem:[%s647_s0 + $0x138] sm:$0xff]  ;;  %v101_v52 = vsel %vm79_vm2, %v26_v42, 0.0  ;;  %v28_v54 = vld [vmem:[%s647_s0 + $0x68] sm:$0xff]  ;;  %v160_v56 = vsel %vm79_vm2, %v53_v45, 0.0  ;;  %v55_v57 = vld [vmem:[%s647_s0 + $0x140] sm:$0xff]  ;;  %v103_v58 = vsel %vm79_vm2, %v27_v48, 0.0 }
   0x9   :  { %v153_v41 = vadd.f32 %v152_v32, %v151_v35  ;;  %v29_v60 = vld [vmem:[%s647_s0 + $0x70] sm:$0xff]  ;;  %v162_v62 = vsel %vm79_vm2, %v54_v51, 0.0 }
   0xa   :  { %v88_v19 = vadd.f32 %v87_v14, %v86_v16 }
   0xb   :  { %v155_v47 = vadd.f32 %v154_v38, %v153_v41 }
   0xc   :  { %v90_v24 = vadd.f32 %v89_v17, %v88_v19 }
   0xd   :  { %v157_v53 = vadd.f32 %v156_v44, %v155_v47 }
   0xe   :  { %v92_v30 = vadd.f32 %v91_v20, %v90_v24 }
   0xf   :  { %v159_v59 = vadd.f32 %v158_v50, %v157_v53 }
  0x10   :  { %v94_v37 = vadd.f32 %v93_v27, %v92_v30 }
  0x12   :  { %v96_v43 = vadd.f32 %v95_v34, %v94_v37 }
  0x14   :  { %v98_v49 = vadd.f32 %v97_v40, %v96_v43 }
  0x16   :  { %v100_v55 = vadd.f32 %v99_v46, %v98_v49 }
  0x18   :  { %v102_v61 = vadd.f32 %v101_v52, %v100_v55 }
  0x19   :  { %8 = vsyncpa [#allocation3], 0  ;;  %v56_v63 = vld [vmem:[%s647_s0 + $0x148] sm:$0xff]  ;;  %v105_v0 = vsel %vm79_vm2, %v28_v54, 0.0  ;;  %v161_v1 = vadd.f32 %v160_v56, %v159_v59  ;;  %v30_v2 = vld [vmem:[%s647_s0 + $0x78] sm:$0xff]  ;;  %v164_v4 = vsel %vm79_vm2, %v55_v57, 0.0 }
  0x1a   :  { %v104_v3 = vadd.f32 %v103_v58, %v102_v61  ;;  %v57_v5 = vld [vmem:[%s647_s0 + $0x150] sm:$0xff]  ;;  %v107_v6 = vsel %vm79_vm2, %v29_v60, 0.0  ;;  %v31_v8 = vld [vmem:[%s647_s0 + $0x80] sm:$0xff]  ;;  %v166_v10 = vsel %vm79_vm2, %v56_v63, 0.0  ;;  %v58_v11 = vld [vmem:[%s647_s0 + $0x158] sm:$0xff]  ;;  %v109_v12 = vsel %vm79_vm2, %v30_v2, 0.0 }
  0x1b   :  { %v163_v7 = vadd.f32 %v162_v62, %v161_v1  ;;  %v32_v14 = vld [vmem:[%s647_s0 + $0x88] sm:$0xff]  ;;  %v168_v16 = vsel %vm79_vm2, %v57_v5, 0.0  ;;  %v59_v17 = vld [vmem:[%s647_s0 + $0x160] sm:$0xff]  ;;  %v111_v18 = vsel %vm79_vm2, %v31_v8, 0.0  ;;  %v33_v20 = vld [vmem:[%s647_s0 + $0x90] sm:$0xff]  ;;  %v170_v22 = vsel %vm79_vm2, %v58_v11, 0.0 }
  0x1c   :  { %v106_v9 = vadd.f32 %v105_v0, %v104_v3  ;;  %v60_v23 = vld [vmem:[%s647_s0 + $0x168] sm:$0xff]  ;;  %v113_v24 = vsel %vm79_vm2, %v32_v14, 0.0  ;;  %v34_v26 = vld [vmem:[%s647_s0 + $0x98] sm:$0xff]  ;;  %v172_v28 = vsel %vm79_vm2, %v59_v17, 0.0  ;;  %v61_v29 = vld [vmem:[%s647_s0 + $0x170] sm:$0xff]  ;;  %v115_v30 = vsel %vm79_vm2, %v33_v20, 0.0 }
  0x1d   :  { %v165_v13 = vadd.f32 %v164_v4, %v163_v7  ;;  %v35_v32 = vld [vmem:[%s647_s0 + $0xa0] sm:$0xff]  ;;  %v174_v34 = vsel %vm79_vm2, %v60_v23, 0.0  ;;  %v62_v35 = vld [vmem:[%s647_s0 + $0x178] sm:$0xff]  ;;  %v117_v36 = vsel %vm79_vm2, %v34_v26, 0.0  ;;  %v36_v38 = vld [vmem:[%s647_s0 + $0xa8] sm:$0xff]  ;;  %v176_v40 = vsel %vm79_vm2, %v61_v29, 0.0 }
  0x1e   :  { %v108_v15 = vadd.f32 %v107_v6, %v106_v9  ;;  %v63_v41 = vld [vmem:[%s647_s0 + $0x180] sm:$0xff]  ;;  %v119_v42 = vsel %vm79_vm2, %v35_v32, 0.0  ;;  %v37_v44 = vld [vmem:[%s647_s0 + $0xb0] sm:$0xff]  ;;  %v178_v46 = vsel %vm79_vm2, %v62_v35, 0.0  ;;  %v64_v47 = vld [vmem:[%s647_s0 + $0x188] sm:$0xff]  ;;  %v121_v48 = vsel %vm79_vm2, %v36_v38, 0.0 }
  0x1f   :  { %v167_v19 = vadd.f32 %v166_v10, %v165_v13  ;;  %v38_v50 = vld [vmem:[%s647_s0 + $0xb8] sm:$0xff]  ;;  %v180_v52 = vsel %vm79_vm2, %v63_v41, 0.0  ;;  %v65_v53 = vld [vmem:[%s647_s0 + $0x190] sm:$0xff]  ;;  %v123_v54 = vsel %vm79_vm2, %v37_v44, 0.0  ;;  %v39_v56 = vld [vmem:[%s647_s0 + $0xc0] sm:$0xff]  ;;  %v182_v58 = vsel %vm79_vm2, %v64_v47, 0.0 }
  0x20   :  { %v110_v21 = vadd.f32 %v109_v12, %v108_v15  ;;  %v66_v59 = vld [vmem:[%s647_s0 + $0x198] sm:$0xff]  ;;  %v125_v60 = vsel %vm79_vm2, %v38_v50, 0.0  ;;  %v40_v62 = vld [vmem:[%s647_s0 + $0xc8] sm:$0xff]  ;;  %v184_v0 = vsel %vm79_vm2, %v65_v53, 0.0  ;;  %v67_v1 = vld [vmem:[%s647_s0 + $0x1a0] sm:$0xff]  ;;  %v127_v2 = vsel %vm79_vm2, %v39_v56, 0.0 }
  0x21   :  { %v169_v25 = vadd.f32 %v168_v16, %v167_v19  ;;  %v41_v4 = vld [vmem:[%s647_s0 + $0xd0] sm:$0xff]  ;;  %v186_v6 = vsel %vm79_vm2, %v66_v59, 0.0  ;;  %v68_v7 = vld [vmem:[%s647_s0 + $0x1a8] sm:$0xff]  ;;  %v129_v8 = vsel %vm79_vm2, %v40_v62, 0.0  ;;  %v42_v10 = vld [vmem:[%s647_s0 + $0xd8] sm:$0xff]  ;;  %v188_v12 = vsel %vm79_vm2, %v67_v1, 0.0 }
  0x22   :  { %v112_v27 = vadd.f32 %v111_v18, %v110_v21  ;;  %v69_v13 = vld [vmem:[%s647_s0 + $0x1b0] sm:$0xff]  ;;  %v131_v14 = vsel %vm79_vm2, %v41_v4, 0.0  ;;  %v43_v16 = vld [vmem:[%s647_s0 + $0xe0] sm:$0xff]  ;;  %v190_v18 = vsel %vm79_vm2, %v68_v7, 0.0  ;;  %v70_v19 = vld [vmem:[%s647_s0 + $0x1b8] sm:$0xff]  ;;  %v133_v20 = vsel %vm79_vm2, %v42_v10, 0.0 }
  0x23   :  { %v171_v31 = vadd.f32 %v170_v22, %v169_v25  ;;  %v44_v22 = vld [vmem:[%s647_s0 + $0xe8] sm:$0xff]  ;;  %v71_v25 = vld [vmem:[%s647_s0 + $0x1c0] sm:$0xff]  ;;  %v135_v26 = vsel %vm79_vm2, %v43_v16, 0.0  ;;  %v78_v59 = vld [vmem:[%s647_s0 + $0x1f8] sm:$0xff]  ;;  %vm230_vm3 = vcmask 1041409   ;;  %s360_s30 = smov [#allocation2]  }
  0x24   :  { %v114_v33 = vadd.f32 %v113_v24, %v112_v27  ;;  %v192_v24 = vsel %vm79_vm2, %v69_v13, 0.0  ;;  %v137_v32 = vsel %vm79_vm2, %v44_v22, 0.0  ;;  %v75_v47 = vld [vmem:[%s647_s0 + $0x1e0] sm:$0xff]  ;;  %s315_s4 = sshll.u32 %s360_s30, 4  ;;  %s316_s4 = int_to_ptr.vmem [resolvable:$true] %s315_s4 }
  0x25   :  { %v173_v37 = vadd.f32 %v172_v28, %v171_v31  ;;  %v45_v28 = vld [vmem:[%s647_s0 + $0xf0] sm:$0xff]  ;;  %v72_v31 = vld [vmem:[%s647_s0 + $0x1c8] sm:$0xff]  ;;  %s336_s5 = scalar_lea.vmem %s316_s4, 32  ;;  %p341_p1 = scmp.lt.s32.totalorder %s316_s4, %s316_s4 }
  0x26   :  { %v116_v39 = vadd.f32 %v115_v30, %v114_v33  ;;  %v194_v30 = vsel %vm79_vm2, %v70_v19, 0.0  ;;  %v139_v38 = vsel %vm79_vm2, %v45_v28, 0.0  ;;  %v198_v41 = vsel %vm79_vm2, %v72_v31, 0.0  ;;  %p337_p0 = scmp.ne.s32.totalorder %s316_s4, %s336_s5  ;;  %p342_p2 = scmp.lt.s32.totalorder %s336_s5, %s336_s5 }
  0x27   :  { %v175_v43 = vadd.f32 %v174_v34, %v173_v37  ;;  %v46_v34 = vld [vmem:[%s647_s0 + $0xf8] sm:$0xff]  ;;  %v73_v37 = vld [vmem:[%s647_s0 + $0x1d0] sm:$0xff] }
  0x28   :  { %v118_v45 = vadd.f32 %v117_v36, %v116_v39  ;;  %v196_v36 = vsel %vm79_vm2, %v71_v25, 0.0  ;;  %p343_p3 = por %p342_p2, %p341_p1 }
  0x29   :  { %v177_v49 = vadd.f32 %v176_v40, %v175_v43  ;;  %v141_v43 = vsel %vm79_vm2, %v46_v34, 0.0 }
  0x2a   :  { %v120_v51 = vadd.f32 %v119_v42, %v118_v45  ;;  %v74_v42 = vld [vmem:[%s647_s0 + $0x1d8] sm:$0xff]  ;;  %p344_p4 = pnand %p343_p3, %p337_p0 }
  0x2b   :  { %v179_v55 = vadd.f32 %v178_v46, %v177_v49  ;;  %v200_v46 = vsel %vm79_vm2, %v73_v37, 0.0  ;;  %v202_v50 = vsel %vm79_vm2, %v74_v42, 0.0 }
  0x2c   :  { %v122_v57 = vadd.f32 %v121_v48, %v120_v51  ;;  %v76_v51 = vld [vmem:[%s647_s0 + $0x1e8] sm:$0xff] }
  0x2d   :  { %v181_v61 = vadd.f32 %v180_v52, %v179_v55  ;;  %v77_v55 = vld [vmem:[%s647_s0 + $0x1f0] sm:$0xff] }
  0x2e   :  { %v124_v63 = vadd.f32 %v123_v54, %v122_v57  ;;  %v204_v54 = vsel %vm79_vm2, %v75_v47, 0.0 }
  0x2f   :  { %v183_v3 = vadd.f32 %v182_v58, %v181_v61  ;;  %v206_v58 = vsel %vm79_vm2, %v76_v51, 0.0  ;;  %v208_v61 = vsel %vm79_vm2, %v77_v55, 0.0 }
  0x30   :  { %v126_v5 = vadd.f32 %v125_v60, %v124_v63 }
  0x31   :  { %v185_v9 = vadd.f32 %v184_v0, %v183_v3  ;;  %v210_v0 = vsel %vm79_vm2, %v78_v59, 0.0 }
  0x32   :  { %v128_v11 = vadd.f32 %v127_v2, %v126_v5 }
  0x33   :  { %v187_v15 = vadd.f32 %v186_v6, %v185_v9 }
  0x34   :  { %v130_v17 = vadd.f32 %v129_v8, %v128_v11 }
  0x35   :  { %v189_v21 = vadd.f32 %v188_v12, %v187_v15  ;;  %v323_v15 = vld [vmem:[%s649_s2] ss:$0 sm:$0xff] }
  0x36   :  { %v132_v23 = vadd.f32 %v131_v14, %v130_v17 }
  0x37   :  { %v191_v27 = vadd.f32 %v190_v18, %v189_v21 }
  0x38   :  { %v134_v29 = vadd.f32 %v133_v20, %v132_v23 }
  0x39   :  { %v193_v33 = vadd.f32 %v192_v24, %v191_v27 }
  0x3a   :  { %v136_v35 = vadd.f32 %v135_v26, %v134_v29 }
  0x3b   :  { %v195_v39 = vadd.f32 %v194_v30, %v193_v33 }
  0x3c   :  { %v138_v40 = vadd.f32 %v137_v32, %v136_v35 }
  0x3d   :  { %v197_v44 = vadd.f32 %v196_v36, %v195_v39 }
  0x3e   :  { %v140_v45 = vadd.f32 %v139_v38, %v138_v40 }
  0x3f   :  { %v199_v48 = vadd.f32 %v198_v41, %v197_v44 }
  0x40   :  { %v142_v49 = vadd.f32 %v141_v43, %v140_v45 }
  0x41   :  { %v201_v52 = vadd.f32 %v200_v46, %v199_v48 }
  0x42   :  { %v143_v53 = vrot.slane %v142_v49, 4 }
  0x43   :  { %v203_v56 = vadd.f32 %v202_v50, %v201_v52 }
  0x44   :  { %v144_v57 = vadd.f32 %v143_v53, %v142_v49 }
  0x45   :  { %v205_v60 = vadd.f32 %v204_v54, %v203_v56 }
  0x46   :  { %v145_v62 = vrot.slane %v144_v57, 2 }
  0x47   :  { %v207_v63 = vadd.f32 %v206_v58, %v205_v60 }
  0x48   :  { %v146_v2 = vadd.f32 %v145_v62, %v144_v57 }
  0x49   :  { %v209_v1 = vadd.f32 %v208_v61, %v207_v63 }
  0x4a   :  { %v147_v5 = vrot.slane %v146_v2, 1 }
  0x4b   :  { %v211_v3 = vadd.f32 %v210_v0, %v209_v1 }
  0x4c   :  { %v148_v8 = vadd.f32 %v147_v5, %v146_v2 }
  0x4d   :  { %v212_v4 = vrot.slane %v211_v3, 4 }
  0x4e   :  { %v218_v12 = vmul.f32 0.00390625, %v148_v8 }
  0x4f   :  { %v213_v6 = vadd.f32 %v212_v4, %v211_v3 }
  0x51   :  { %v214_v7 = vrot.slane %v213_v6, 2 }
  0x53   :  { %v215_v9 = vadd.f32 %v214_v7, %v213_v6 }
  0x55   :  { %v216_v10 = vrot.slane %v215_v9, 1 }
  0x57   :  { %v217_v11 = vadd.f32 %v216_v10, %v215_v9 }
  0x59   :  { %v219_v13 = vmul.f32 0.00390625, %v217_v11 }
  0x5b   :  { %v231_v14 = vsel %vm230_vm3, %v219_v13, %v218_v12 }
  0x5c   :  { %331 = vmatmul.mubr.msk.f32.vlgmr.msra.gmra.mxu0 %vm79_vm2, %v231_v14 }
 0x11c   :  { %v304_v16 = vpop.f32.mrf.mxu0 }
 0x11d   :  { %v305_v17 = vadd.f32 %v323_v15, %v304_v16 }
 0x11e   :  { %v332_v18 = vpop.f32.mrf.mxu0 }
 0x11f   :  { %308 = vst [vmem:[#allocation2] sm:$0x3] %v305_v17 }
 0x120   :  { %347 = shalt.err (!%p344_p4)
}
 0x121   :  { %318 = dma.vmem_to_hbm [thread:$0]  %s316_s4, 32, %s650_s3, [#allocation3]  }
 0x122   :  { %356 = dma.done.wait [#allocation3], 32  }
 0x123   :  { %357 = vsyncadd [#allocation3], 4294967264 }
 0x124   :  { %322 = vsyncpa [#allocation3], 1 }

// kernel: _output_layer_impl.1
= control target key start
LH: loop header
LB: loop body
LE: loop exit
PB: predicated region body
PF: predicated region fallthrough
CT: control target
= control target key end

     0   :  { %vm234_vm0 = vcmask 1043456   ;;  %v358_v2 = vmov 0.0   ;;  %vm359_vm1 = vmmov 0   ;;  %vm79_vm2 = vcmask 31744   ;;  %s647_s0 = inlined_call_operand.vmem [shape: f32[2,256,4], index: 0, kind: input, shape index: {}]   ;;  %s648_s1 = inlined_call_operand.vmem [shape: f32[4,128], index: 1, kind: input, shape index: {}]   ;;  %s649_s2 = inlined_call_operand.vmem [shape: f32[1,128], index: 2, kind: input, shape index: {}]   ;;  %s650_s3 = inlined_call_operand.hbm [shape: f32[2,128], index: 3, kind: output, shape index: {}]  }
   0x1   :  { %v220_v0 = vld [vmem:[%s648_s1] sm:$0xf]  ;;  %328 = vmatprep.subr.mxu0 %v358_v2  ;;  %330 = vmatprep.mubr.msk.f32.mxu0 %vm359_vm1, %v358_v2  ;;  %v16_v3 = vld [vmem:[%s647_s0 + $0x8] sm:$0xff]  ;;  %v17_v4 = vld [vmem:[%s647_s0 + $0x10] sm:$0xff] }
   0x2   :  { %v15_v1 = vld [vmem:[%s647_s0] sm:$0xff]  ;;  %v18_v5 = vld [vmem:[%s647_s0 + $0x18] sm:$0xff]  ;;  %329 = vmatpush3.msk.msra.mxu0 %vm234_vm0, %v220_v0  ;;  %v81_v7 = vsel %vm79_vm2, %v16_v3, 0.0  ;;  %v83_v8 = vsel %vm79_vm2, %v17_v4, 0.0  ;;  %v20_v12 = vld [vmem:[%s647_s0 + $0x28] sm:$0xff] }
   0x3   :  { %v80_v6 = vsel %vm79_vm2, %v15_v1, 0.0  ;;  %v19_v9 = vld [vmem:[%s647_s0 + $0x20] sm:$0xff]  ;;  %v85_v11 = vsel %vm79_vm2, %v18_v5, 0.0  ;;  %v21_v15 = vld [vmem:[%s647_s0 + $0x30] sm:$0xff]  ;;  %v89_v17 = vsel %vm79_vm2, %v20_v12, 0.0  ;;  %v22_v18 = vld [vmem:[%s647_s0 + $0x38] sm:$0xff] }
   0x4   :  { %v82_v10 = vadd.f32 %v81_v7, %v80_v6  ;;  %v87_v14 = vsel %vm79_vm2, %v19_v9, 0.0  ;;  %v91_v20 = vsel %vm79_vm2, %v21_v15, 0.0  ;;  %v23_v21 = vld [vmem:[%s647_s0 + $0x40] sm:$0xff]  ;;  %v48_v23 = vld [vmem:[%s647_s0 + $0x108] sm:$0xff]  ;;  %v49_v25 = vld [vmem:[%s647_s0 + $0x110] sm:$0xff]  ;;  %v93_v27 = vsel %vm79_vm2, %v22_v18, 0.0 }
   0x5   :  { %v47_v22 = vld [vmem:[%s647_s0 + $0x100] sm:$0xff]  ;;  %v50_v26 = vld [vmem:[%s647_s0 + $0x118] sm:$0xff]  ;;  %v24_v29 = vld [vmem:[%s647_s0 + $0x48] sm:$0xff]  ;;  %v150_v31 = vsel %vm79_vm2, %v48_v23, 0.0  ;;  %v152_v32 = vsel %vm79_vm2, %v49_v25, 0.0  ;;  %v95_v34 = vsel %vm79_vm2, %v23_v21, 0.0 }
   0x6   :  { %v84_v13 = vadd.f32 %v83_v8, %v82_v10  ;;  %v149_v28 = vsel %vm79_vm2, %v47_v22, 0.0  ;;  %v51_v33 = vld [vmem:[%s647_s0 + $0x120] sm:$0xff]  ;;  %v25_v36 = vld [vmem:[%s647_s0 + $0x50] sm:$0xff]  ;;  %v154_v38 = vsel %vm79_vm2, %v50_v26, 0.0  ;;  %v52_v39 = vld [vmem:[%s647_s0 + $0x128] sm:$0xff]  ;;  %v97_v40 = vsel %vm79_vm2, %v24_v29, 0.0 }
   0x7   :  { %v151_v35 = vadd.f32 %v150_v31, %v149_v28  ;;  %v26_v42 = vld [vmem:[%s647_s0 + $0x58] sm:$0xff]  ;;  %v156_v44 = vsel %vm79_vm2, %v51_v33, 0.0  ;;  %v53_v45 = vld [vmem:[%s647_s0 + $0x130] sm:$0xff]  ;;  %v99_v46 = vsel %vm79_vm2, %v25_v36, 0.0  ;;  %v27_v48 = vld [vmem:[%s647_s0 + $0x60] sm:$0xff]  ;;  %v158_v50 = vsel %vm79_vm2, %v52_v39, 0.0 }
   0x8   :  { %v86_v16 = vadd.f32 %v85_v11, %v84_v13  ;;  %v54_v51 = vld [vmem:[%s647_s0 + $0x138] sm:$0xff]  ;;  %v101_v52 = vsel %vm79_vm2, %v26_v42, 0.0  ;;  %v28_v54 = vld [vmem:[%s647_s0 + $0x68] sm:$0xff]  ;;  %v160_v56 = vsel %vm79_vm2, %v53_v45, 0.0  ;;  %v55_v57 = vld [vmem:[%s647_s0 + $0x140] sm:$0xff]  ;;  %v103_v58 = vsel %vm79_vm2, %v27_v48, 0.0 }
   0x9   :  { %v153_v41 = vadd.f32 %v152_v32, %v151_v35  ;;  %v29_v60 = vld [vmem:[%s647_s0 + $0x70] sm:$0xff]  ;;  %v162_v62 = vsel %vm79_vm2, %v54_v51, 0.0 }
   0xa   :  { %v88_v19 = vadd.f32 %v87_v14, %v86_v16 }
   0xb   :  { %v155_v47 = vadd.f32 %v154_v38, %v153_v41 }
   0xc   :  { %v90_v24 = vadd.f32 %v89_v17, %v88_v19 }
   0xd   :  { %v157_v53 = vadd.f32 %v156_v44, %v155_v47 }
   0xe   :  { %v92_v30 = vadd.f32 %v91_v20, %v90_v24 }
   0xf   :  { %v159_v59 = vadd.f32 %v158_v50, %v157_v53 }
  0x10   :  { %v94_v37 = vadd.f32 %v93_v27, %v92_v30 }
  0x12   :  { %v96_v43 = vadd.f32 %v95_v34, %v94_v37 }
  0x14   :  { %v98_v49 = vadd.f32 %v97_v40, %v96_v43 }
  0x16   :  { %v100_v55 = vadd.f32 %v99_v46, %v98_v49 }
  0x18   :  { %v102_v61 = vadd.f32 %v101_v52, %v100_v55 }
  0x19   :  { %8 = vsyncpa [#allocation3], 0  ;;  %v56_v63 = vld [vmem:[%s647_s0 + $0x148] sm:$0xff]  ;;  %v105_v0 = vsel %vm79_vm2, %v28_v54, 0.0  ;;  %v161_v1 = vadd.f32 %v160_v56, %v159_v59  ;;  %v30_v2 = vld [vmem:[%s647_s0 + $0x78] sm:$0xff]  ;;  %v164_v4 = vsel %vm79_vm2, %v55_v57, 0.0 }
  0x1a   :  { %v104_v3 = vadd.f32 %v103_v58, %v102_v61  ;;  %v57_v5 = vld [vmem:[%s647_s0 + $0x150] sm:$0xff]  ;;  %v107_v6 = vsel %vm79_vm2, %v29_v60, 0.0  ;;  %v31_v8 = vld [vmem:[%s647_s0 + $0x80] sm:$0xff]  ;;  %v166_v10 = vsel %vm79_vm2, %v56_v63, 0.0  ;;  %v58_v11 = vld [vmem:[%s647_s0 + $0x158] sm:$0xff]  ;;  %v109_v12 = vsel %vm79_vm2, %v30_v2, 0.0 }
  0x1b   :  { %v163_v7 = vadd.f32 %v162_v62, %v161_v1  ;;  %v32_v14 = vld [vmem:[%s647_s0 + $0x88] sm:$0xff]  ;;  %v168_v16 = vsel %vm79_vm2, %v57_v5, 0.0  ;;  %v59_v17 = vld [vmem:[%s647_s0 + $0x160] sm:$0xff]  ;;  %v111_v18 = vsel %vm79_vm2, %v31_v8, 0.0  ;;  %v33_v20 = vld [vmem:[%s647_s0 + $0x90] sm:$0xff]  ;;  %v170_v22 = vsel %vm79_vm2, %v58_v11, 0.0 }
  0x1c   :  { %v106_v9 = vadd.f32 %v105_v0, %v104_v3  ;;  %v60_v23 = vld [vmem:[%s647_s0 + $0x168] sm:$0xff]  ;;  %v113_v24 = vsel %vm79_vm2, %v32_v14, 0.0  ;;  %v34_v26 = vld [vmem:[%s647_s0 + $0x98] sm:$0xff]  ;;  %v172_v28 = vsel %vm79_vm2, %v59_v17, 0.0  ;;  %v61_v29 = vld [vmem:[%s647_s0 + $0x170] sm:$0xff]  ;;  %v115_v30 = vsel %vm79_vm2, %v33_v20, 0.0 }
  0x1d   :  { %v165_v13 = vadd.f32 %v164_v4, %v163_v7  ;;  %v35_v32 = vld [vmem:[%s647_s0 + $0xa0] sm:$0xff]  ;;  %v174_v34 = vsel %vm79_vm2, %v60_v23, 0.0  ;;  %v62_v35 = vld [vmem:[%s647_s0 + $0x178] sm:$0xff]  ;;  %v117_v36 = vsel %vm79_vm2, %v34_v26, 0.0  ;;  %v36_v38 = vld [vmem:[%s647_s0 + $0xa8] sm:$0xff]  ;;  %v176_v40 = vsel %vm79_vm2, %v61_v29, 0.0 }
  0x1e   :  { %v108_v15 = vadd.f32 %v107_v6, %v106_v9  ;;  %v63_v41 = vld [vmem:[%s647_s0 + $0x180] sm:$0xff]  ;;  %v119_v42 = vsel %vm79_vm2, %v35_v32, 0.0  ;;  %v37_v44 = vld [vmem:[%s647_s0 + $0xb0] sm:$0xff]  ;;  %v178_v46 = vsel %vm79_vm2, %v62_v35, 0.0  ;;  %v64_v47 = vld [vmem:[%s647_s0 + $0x188] sm:$0xff]  ;;  %v121_v48 = vsel %vm79_vm2, %v36_v38, 0.0 }
  0x1f   :  { %v167_v19 = vadd.f32 %v166_v10, %v165_v13  ;;  %v38_v50 = vld [vmem:[%s647_s0 + $0xb8] sm:$0xff]  ;;  %v180_v52 = vsel %vm79_vm2, %v63_v41, 0.0  ;;  %v65_v53 = vld [vmem:[%s647_s0 + $0x190] sm:$0xff]  ;;  %v123_v54 = vsel %vm79_vm2, %v37_v44, 0.0  ;;  %v39_v56 = vld [vmem:[%s647_s0 + $0xc0] sm:$0xff]  ;;  %v182_v58 = vsel %vm79_vm2, %v64_v47, 0.0 }
  0x20   :  { %v110_v21 = vadd.f32 %v109_v12, %v108_v15  ;;  %v66_v59 = vld [vmem:[%s647_s0 + $0x198] sm:$0xff]  ;;  %v125_v60 = vsel %vm79_vm2, %v38_v50, 0.0  ;;  %v40_v62 = vld [vmem:[%s647_s0 + $0xc8] sm:$0xff]  ;;  %v184_v0 = vsel %vm79_vm2, %v65_v53, 0.0  ;;  %v67_v1 = vld [vmem:[%s647_s0 + $0x1a0] sm:$0xff]  ;;  %v127_v2 = vsel %vm79_vm2, %v39_v56, 0.0 }
  0x21   :  { %v169_v25 = vadd.f32 %v168_v16, %v167_v19  ;;  %v41_v4 = vld [vmem:[%s647_s0 + $0xd0] sm:$0xff]  ;;  %v186_v6 = vsel %vm79_vm2, %v66_v59, 0.0  ;;  %v68_v7 = vld [vmem:[%s647_s0 + $0x1a8] sm:$0xff]  ;;  %v129_v8 = vsel %vm79_vm2, %v40_v62, 0.0  ;;  %v42_v10 = vld [vmem:[%s647_s0 + $0xd8] sm:$0xff]  ;;  %v188_v12 = vsel %vm79_vm2, %v67_v1, 0.0 }
  0x22   :  { %v112_v27 = vadd.f32 %v111_v18, %v110_v21  ;;  %v69_v13 = vld [vmem:[%s647_s0 + $0x1b0] sm:$0xff]  ;;  %v131_v14 = vsel %vm79_vm2, %v41_v4, 0.0  ;;  %v43_v16 = vld [vmem:[%s647_s0 + $0xe0] sm:$0xff]  ;;  %v190_v18 = vsel %vm79_vm2, %v68_v7, 0.0  ;;  %v70_v19 = vld [vmem:[%s647_s0 + $0x1b8] sm:$0xff]  ;;  %v133_v20 = vsel %vm79_vm2, %v42_v10, 0.0 }
  0x23   :  { %v171_v31 = vadd.f32 %v170_v22, %v169_v25  ;;  %v44_v22 = vld [vmem:[%s647_s0 + $0xe8] sm:$0xff]  ;;  %v71_v25 = vld [vmem:[%s647_s0 + $0x1c0] sm:$0xff]  ;;  %v135_v26 = vsel %vm79_vm2, %v43_v16, 0.0  ;;  %v78_v59 = vld [vmem:[%s647_s0 + $0x1f8] sm:$0xff]  ;;  %vm230_vm3 = vcmask 1041409   ;;  %s360_s30 = smov [#allocation2]  }
  0x24   :  { %v114_v33 = vadd.f32 %v113_v24, %v112_v27  ;;  %v192_v24 = vsel %vm79_vm2, %v69_v13, 0.0  ;;  %v137_v32 = vsel %vm79_vm2, %v44_v22, 0.0  ;;  %v75_v47 = vld [vmem:[%s647_s0 + $0x1e0] sm:$0xff]  ;;  %s315_s4 = sshll.u32 %s360_s30, 4  ;;  %s316_s4 = int_to_ptr.vmem [resolvable:$true] %s315_s4 }
  0x25   :  { %v173_v37 = vadd.f32 %v172_v28, %v171_v31  ;;  %v45_v28 = vld [vmem:[%s647_s0 + $0xf0] sm:$0xff]  ;;  %v72_v31 = vld [vmem:[%s647_s0 + $0x1c8] sm:$0xff]  ;;  %s336_s5 = scalar_lea.vmem %s316_s4, 32  ;;  %p341_p1 = scmp.lt.s32.totalorder %s316_s4, %s316_s4 }
  0x26   :  { %v116_v39 = vadd.f32 %v115_v30, %v114_v33  ;;  %v194_v30 = vsel %vm79_vm2, %v70_v19, 0.0  ;;  %v139_v38 = vsel %vm79_vm2, %v45_v28, 0.0  ;;  %v198_v41 = vsel %vm79_vm2, %v72_v31, 0.0  ;;  %p337_p0 = scmp.ne.s32.totalorder %s316_s4, %s336_s5  ;;  %p342_p2 = scmp.lt.s32.totalorder %s336_s5, %s336_s5 }
  0x27   :  { %v175_v43 = vadd.f32 %v174_v34, %v173_v37  ;;  %v46_v34 = vld [vmem:[%s647_s0 + $0xf8] sm:$0xff]  ;;  %v73_v37 = vld [vmem:[%s647_s0 + $0x1d0] sm:$0xff] }
  0x28   :  { %v118_v45 = vadd.f32 %v117_v36, %v116_v39  ;;  %v196_v36 = vsel %vm79_vm2, %v71_v25, 0.0  ;;  %p343_p3 = por %p342_p2, %p341_p1 }
  0x29   :  { %v177_v49 = vadd.f32 %v176_v40, %v175_v43  ;;  %v141_v43 = vsel %vm79_vm2, %v46_v34, 0.0 }
  0x2a   :  { %v120_v51 = vadd.f32 %v119_v42, %v118_v45  ;;  %v74_v42 = vld [vmem:[%s647_s0 + $0x1d8] sm:$0xff]  ;;  %p344_p4 = pnand %p343_p3, %p337_p0 }
  0x2b   :  { %v179_v55 = vadd.f32 %v178_v46, %v177_v49  ;;  %v200_v46 = vsel %vm79_vm2, %v73_v37, 0.0  ;;  %v202_v50 = vsel %vm79_vm2, %v74_v42, 0.0 }
  0x2c   :  { %v122_v57 = vadd.f32 %v121_v48, %v120_v51  ;;  %v76_v51 = vld [vmem:[%s647_s0 + $0x1e8] sm:$0xff] }
  0x2d   :  { %v181_v61 = vadd.f32 %v180_v52, %v179_v55  ;;  %v77_v55 = vld [vmem:[%s647_s0 + $0x1f0] sm:$0xff] }
  0x2e   :  { %v124_v63 = vadd.f32 %v123_v54, %v122_v57  ;;  %v204_v54 = vsel %vm79_vm2, %v75_v47, 0.0 }
  0x2f   :  { %v183_v3 = vadd.f32 %v182_v58, %v181_v61  ;;  %v206_v58 = vsel %vm79_vm2, %v76_v51, 0.0  ;;  %v208_v61 = vsel %vm79_vm2, %v77_v55, 0.0 }
  0x30   :  { %v126_v5 = vadd.f32 %v125_v60, %v124_v63 }
  0x31   :  { %v185_v9 = vadd.f32 %v184_v0, %v183_v3  ;;  %v210_v0 = vsel %vm79_vm2, %v78_v59, 0.0 }
  0x32   :  { %v128_v11 = vadd.f32 %v127_v2, %v126_v5 }
  0x33   :  { %v187_v15 = vadd.f32 %v186_v6, %v185_v9 }
  0x34   :  { %v130_v17 = vadd.f32 %v129_v8, %v128_v11 }
  0x35   :  { %v189_v21 = vadd.f32 %v188_v12, %v187_v15  ;;  %v323_v15 = vld [vmem:[%s649_s2] ss:$0 sm:$0xff] }
  0x36   :  { %v132_v23 = vadd.f32 %v131_v14, %v130_v17 }
  0x37   :  { %v191_v27 = vadd.f32 %v190_v18, %v189_v21 }
  0x38   :  { %v134_v29 = vadd.f32 %v133_v20, %v132_v23 }
  0x39   :  { %v193_v33 = vadd.f32 %v192_v24, %v191_v27 }
  0x3a   :  { %v136_v35 = vadd.f32 %v135_v26, %v134_v29 }
  0x3b   :  { %v195_v39 = vadd.f32 %v194_v30, %v193_v33 }
  0x3c   :  { %v138_v40 = vadd.f32 %v137_v32, %v136_v35 }
  0x3d   :  { %v197_v44 = vadd.f32 %v196_v36, %v195_v39 }
  0x3e   :  { %v140_v45 = vadd.f32 %v139_v38, %v138_v40 }
  0x3f   :  { %v199_v48 = vadd.f32 %v198_v41, %v197_v44 }
  0x40   :  { %v142_v49 = vadd.f32 %v141_v43, %v140_v45 }
  0x41   :  { %v201_v52 = vadd.f32 %v200_v46, %v199_v48 }
  0x42   :  { %v143_v53 = vrot.slane %v142_v49, 4 }
  0x43   :  { %v203_v56 = vadd.f32 %v202_v50, %v201_v52 }
  0x44   :  { %v144_v57 = vadd.f32 %v143_v53, %v142_v49 }
  0x45   :  { %v205_v60 = vadd.f32 %v204_v54, %v203_v56 }
  0x46   :  { %v145_v62 = vrot.slane %v144_v57, 2 }
  0x47   :  { %v207_v63 = vadd.f32 %v206_v58, %v205_v60 }
  0x48   :  { %v146_v2 = vadd.f32 %v145_v62, %v144_v57 }
  0x49   :  { %v209_v1 = vadd.f32 %v208_v61, %v207_v63 }
  0x4a   :  { %v147_v5 = vrot.slane %v146_v2, 1 }
  0x4b   :  { %v211_v3 = vadd.f32 %v210_v0, %v209_v1 }
  0x4c   :  { %v148_v8 = vadd.f32 %v147_v5, %v146_v2 }
  0x4d   :  { %v212_v4 = vrot.slane %v211_v3, 4 }
  0x4e   :  { %v218_v12 = vmul.f32 0.00390625, %v148_v8 }
  0x4f   :  { %v213_v6 = vadd.f32 %v212_v4, %v211_v3 }
  0x51   :  { %v214_v7 = vrot.slane %v213_v6, 2 }
  0x53   :  { %v215_v9 = vadd.f32 %v214_v7, %v213_v6 }
  0x55   :  { %v216_v10 = vrot.slane %v215_v9, 1 }
  0x57   :  { %v217_v11 = vadd.f32 %v216_v10, %v215_v9 }
  0x59   :  { %v219_v13 = vmul.f32 0.00390625, %v217_v11 }
  0x5b   :  { %v231_v14 = vsel %vm230_vm3, %v219_v13, %v218_v12 }
  0x5c   :  { %331 = vmatmul.mubr.msk.f32.vlgmr.msra.gmra.mxu0 %vm79_vm2, %v231_v14 }
 0x11c   :  { %v304_v16 = vpop.f32.mrf.mxu0 }
 0x11d   :  { %v305_v17 = vadd.f32 %v323_v15, %v304_v16 }
 0x11e   :  { %v332_v18 = vpop.f32.mrf.mxu0 }
 0x11f   :  { %308 = vst [vmem:[#allocation2] sm:$0x3] %v305_v17 }
 0x120   :  { %347 = shalt.err (!%p344_p4)
}
 0x121   :  { %318 = dma.vmem_to_hbm [thread:$0]  %s316_s4, 32, %s650_s3, [#allocation3]  }
 0x122   :  { %356 = dma.done.wait [#allocation3], 32  }
 0x123   :  { %357 = vsyncadd [#allocation3], 4294967264 }
 0x124   :  { %322 = vsyncpa [#allocation3], 1 }

</bundles_post_ra>
